<compile_context>
chip_gen: v7x
topology: tpu7x:2x2x1
jax: 0.10.0
libtpu: 0.0.40
codegen_flags: <defaults>
</compile_context>

<pallas_src>
import jax
import jax.numpy as jnp
from jax.experimental import pallas as pl
from jax.experimental.pallas import tpu as pltpu

REG_MAX = 16  # discrete bins = reg_max + 1 = 17


def _integral_kernel(x_ref, o_ref):
    # x_ref: (n_bins, tile_r, 128)   o_ref: (tile_r, 128)
    n_bins = x_ref.shape[0]

    # Pass 1: running max over bins (numerical stability). Each step is a
    # plain element-wise max over a fully packed (tile_r, 128) tile.
    m = x_ref[0].astype(jnp.float32)
    for i in range(1, n_bins):
        m = jnp.maximum(m, x_ref[i].astype(jnp.float32))

    # Pass 2: fused exp / sum / weighted-sum over bins.
    #   den = sum_i exp(x_i - m)
    #   num = sum_i exp(x_i - m) * i        (project[i] == i exactly)
    den = jnp.exp(x_ref[0].astype(jnp.float32) - m)   # weight 0 -> no num term
    num = jnp.zeros_like(m)
    for i in range(1, n_bins):
        e = jnp.exp(x_ref[i].astype(jnp.float32) - m)
        den = den + e
        num = num + e * float(i)

    o_ref[...] = (num * pl.reciprocal(den, approx=False)).astype(o_ref.dtype)


def integral(x, reg_max=REG_MAX, *, target_tile_r=512):
    """x: (N, 4*(reg_max+1)) -> (N, 4), out[n, d] = sum_i softmax(x)[n, d, i] * i."""
    n_bins = reg_max + 1
    N, C = x.shape
    assert C == 4 * n_bins, f"expected last dim {4 * n_bins}, got {C}"
    assert target_tile_r % 8 == 0, "row-slab tile must be a multiple of 8"

    M = N * 4
    R0 = -(-M // 128)                       # ceil(M / 128): number of 128-lane slabs
    if R0 <= target_tile_r:
        tile_r = R0                         # single grid step; block == full dim
        R = R0
    else:
        tile_r = target_tile_r
        R = -(-R0 // tile_r) * tile_r       # pad so the grid divides evenly
    M_pad = R * 128

    # Layout plumbing: bins outermost, (rows*dirs) flattened & lane-padded.
    xt = jnp.transpose(x.reshape(N, 4, n_bins), (2, 0, 1)).reshape(n_bins, M)
    if M_pad != M:
        xt = jnp.pad(xt, ((0, 0), (0, M_pad - M)))
    x3 = xt.reshape(n_bins, R, 128)

    out2d = pl.pallas_call(
        _integral_kernel,
        out_shape=jax.ShapeDtypeStruct((R, 128), x.dtype),
        grid_spec=pltpu.PrefetchScalarGridSpec(
            num_scalar_prefetch=0,
            grid=(R // tile_r,),
            in_specs=[pl.BlockSpec((n_bins, tile_r, 128), lambda i: (0, i, 0))],
            out_specs=pl.BlockSpec((tile_r, 128), lambda i: (i, 0)),
        ),
        compiler_params=pltpu.CompilerParams(
            dimension_semantics=("parallel",)),
    )(x3)

    return out2d.reshape(M_pad)[:M].reshape(N, 4)


def _reference(x, reg_max=REG_MAX):
    n_bins = reg_max + 1
    shape = x.shape
    p = jax.nn.softmax(x.reshape(*shape[:-1], 4, n_bins).astype(jnp.float32), axis=-1)
    proj = jnp.linspace(0.0, float(reg_max), n_bins, dtype=jnp.float32)
    return jnp.einsum("...b,b->...", p, proj).reshape(*shape[:-1], 4).astype(x.dtype)


if __name__ == "__main__":
    key = jax.random.PRNGKey(0)

    # Small shape consistent with the module: N = flattened (batch * priors) rows.
    N = 32
    x = jax.random.normal(key, (N, 4 * (REG_MAX + 1)), dtype=jnp.float32) * 3.0
    out = jax.block_until_ready(integral(x))
    ref = _reference(x)
    assert out.shape == (N, 4), out.shape
    assert jnp.allclose(out, ref, atol=1e-4, rtol=1e-4), float(jnp.max(jnp.abs(out - ref)))

    # Second check: N not a multiple of 32 and a multi-step grid
    # (exercises zero-padding + lane-dense tiling + pipelining paths).
    N2 = 1000
    x2 = jax.random.normal(jax.random.PRNGKey(1), (N2, 4 * (REG_MAX + 1)), jnp.float32) * 3.0
    out2 = jax.block_until_ready(integral(x2, target_tile_r=8))
    ref2 = _reference(x2)
    assert out2.shape == (N2, 4), out2.shape
    assert jnp.allclose(out2, ref2, atol=1e-4, rtol=1e-4), float(jnp.max(jnp.abs(out2 - ref2)))

    print("KERNEL_OK")
</pallas_src>

<mosaic_0001>
module attributes {stable_mosaic.version = 11 : i64} {
  func.func @_integral_kernel(%arg0: i32, %arg1: memref<17x1x128xf32, #tpu.memory_space<vmem>>, %arg2: memref<1x128xf32, #tpu.memory_space<vmem>>) attributes {dimension_semantics = [#tpu.dimension_semantics<parallel>], iteration_bounds = array<i64: 1>, scalar_prefetch = 0 : i64, scratch_operands = 0 : i64, tpu.core_type = #tpu.core_type<tc>, window_params = [{transform_indices = @transform_0, window_bounds = array<i64: 17, 1, 128>}, {transform_indices = @transform_1, window_bounds = array<i64: 1, 128>}]} {
    %c0 = arith.constant 0 : index
    %c0_0 = arith.constant 0 : index
    %c0_1 = arith.constant 0 : index
    %0 = vector.load %arg1[%c0, %c0_0, %c0_1] : memref<17x1x128xf32, #tpu.memory_space<vmem>>, vector<1x1x128xf32>
    %1 = vector.shape_cast %0 : vector<1x1x128xf32> to vector<1x128xf32>
    %c1 = arith.constant 1 : index
    %c0_2 = arith.constant 0 : index
    %c0_3 = arith.constant 0 : index
    %2 = vector.load %arg1[%c1, %c0_2, %c0_3] : memref<17x1x128xf32, #tpu.memory_space<vmem>>, vector<1x1x128xf32>
    %3 = vector.shape_cast %2 : vector<1x1x128xf32> to vector<1x128xf32>
    %4 = arith.maximumf %1, %3 : vector<1x128xf32>
    %c2 = arith.constant 2 : index
    %c0_4 = arith.constant 0 : index
    %c0_5 = arith.constant 0 : index
    %5 = vector.load %arg1[%c2, %c0_4, %c0_5] : memref<17x1x128xf32, #tpu.memory_space<vmem>>, vector<1x1x128xf32>
    %6 = vector.shape_cast %5 : vector<1x1x128xf32> to vector<1x128xf32>
    %7 = arith.maximumf %4, %6 : vector<1x128xf32>
    %c3 = arith.constant 3 : index
    %c0_6 = arith.constant 0 : index
    %c0_7 = arith.constant 0 : index
    %8 = vector.load %arg1[%c3, %c0_6, %c0_7] : memref<17x1x128xf32, #tpu.memory_space<vmem>>, vector<1x1x128xf32>
    %9 = vector.shape_cast %8 : vector<1x1x128xf32> to vector<1x128xf32>
    %10 = arith.maximumf %7, %9 : vector<1x128xf32>
    %c4 = arith.constant 4 : index
    %c0_8 = arith.constant 0 : index
    %c0_9 = arith.constant 0 : index
    %11 = vector.load %arg1[%c4, %c0_8, %c0_9] : memref<17x1x128xf32, #tpu.memory_space<vmem>>, vector<1x1x128xf32>
    %12 = vector.shape_cast %11 : vector<1x1x128xf32> to vector<1x128xf32>
    %13 = arith.maximumf %10, %12 : vector<1x128xf32>
    %c5 = arith.constant 5 : index
    %c0_10 = arith.constant 0 : index
    %c0_11 = arith.constant 0 : index
    %14 = vector.load %arg1[%c5, %c0_10, %c0_11] : memref<17x1x128xf32, #tpu.memory_space<vmem>>, vector<1x1x128xf32>
    %15 = vector.shape_cast %14 : vector<1x1x128xf32> to vector<1x128xf32>
    %16 = arith.maximumf %13, %15 : vector<1x128xf32>
    %c6 = arith.constant 6 : index
    %c0_12 = arith.constant 0 : index
    %c0_13 = arith.constant 0 : index
    %17 = vector.load %arg1[%c6, %c0_12, %c0_13] : memref<17x1x128xf32, #tpu.memory_space<vmem>>, vector<1x1x128xf32>
    %18 = vector.shape_cast %17 : vector<1x1x128xf32> to vector<1x128xf32>
    %19 = arith.maximumf %16, %18 : vector<1x128xf32>
    %c7 = arith.constant 7 : index
    %c0_14 = arith.constant 0 : index
    %c0_15 = arith.constant 0 : index
    %20 = vector.load %arg1[%c7, %c0_14, %c0_15] : memref<17x1x128xf32, #tpu.memory_space<vmem>>, vector<1x1x128xf32>
    %21 = vector.shape_cast %20 : vector<1x1x128xf32> to vector<1x128xf32>
    %22 = arith.maximumf %19, %21 : vector<1x128xf32>
    %c8 = arith.constant 8 : index
    %c0_16 = arith.constant 0 : index
    %c0_17 = arith.constant 0 : index
    %23 = vector.load %arg1[%c8, %c0_16, %c0_17] : memref<17x1x128xf32, #tpu.memory_space<vmem>>, vector<1x1x128xf32>
    %24 = vector.shape_cast %23 : vector<1x1x128xf32> to vector<1x128xf32>
    %25 = arith.maximumf %22, %24 : vector<1x128xf32>
    %c9 = arith.constant 9 : index
    %c0_18 = arith.constant 0 : index
    %c0_19 = arith.constant 0 : index
    %26 = vector.load %arg1[%c9, %c0_18, %c0_19] : memref<17x1x128xf32, #tpu.memory_space<vmem>>, vector<1x1x128xf32>
    %27 = vector.shape_cast %26 : vector<1x1x128xf32> to vector<1x128xf32>
    %28 = arith.maximumf %25, %27 : vector<1x128xf32>
    %c10 = arith.constant 10 : index
    %c0_20 = arith.constant 0 : index
    %c0_21 = arith.constant 0 : index
    %29 = vector.load %arg1[%c10, %c0_20, %c0_21] : memref<17x1x128xf32, #tpu.memory_space<vmem>>, vector<1x1x128xf32>
    %30 = vector.shape_cast %29 : vector<1x1x128xf32> to vector<1x128xf32>
    %31 = arith.maximumf %28, %30 : vector<1x128xf32>
    %c11 = arith.constant 11 : index
    %c0_22 = arith.constant 0 : index
    %c0_23 = arith.constant 0 : index
    %32 = vector.load %arg1[%c11, %c0_22, %c0_23] : memref<17x1x128xf32, #tpu.memory_space<vmem>>, vector<1x1x128xf32>
    %33 = vector.shape_cast %32 : vector<1x1x128xf32> to vector<1x128xf32>
    %34 = arith.maximumf %31, %33 : vector<1x128xf32>
    %c12 = arith.constant 12 : index
    %c0_24 = arith.constant 0 : index
    %c0_25 = arith.constant 0 : index
    %35 = vector.load %arg1[%c12, %c0_24, %c0_25] : memref<17x1x128xf32, #tpu.memory_space<vmem>>, vector<1x1x128xf32>
    %36 = vector.shape_cast %35 : vector<1x1x128xf32> to vector<1x128xf32>
    %37 = arith.maximumf %34, %36 : vector<1x128xf32>
    %c13 = arith.constant 13 : index
    %c0_26 = arith.constant 0 : index
    %c0_27 = arith.constant 0 : index
    %38 = vector.load %arg1[%c13, %c0_26, %c0_27] : memref<17x1x128xf32, #tpu.memory_space<vmem>>, vector<1x1x128xf32>
    %39 = vector.shape_cast %38 : vector<1x1x128xf32> to vector<1x128xf32>
    %40 = arith.maximumf %37, %39 : vector<1x128xf32>
    %c14 = arith.constant 14 : index
    %c0_28 = arith.constant 0 : index
    %c0_29 = arith.constant 0 : index
    %41 = vector.load %arg1[%c14, %c0_28, %c0_29] : memref<17x1x128xf32, #tpu.memory_space<vmem>>, vector<1x1x128xf32>
    %42 = vector.shape_cast %41 : vector<1x1x128xf32> to vector<1x128xf32>
    %43 = arith.maximumf %40, %42 : vector<1x128xf32>
    %c15 = arith.constant 15 : index
    %c0_30 = arith.constant 0 : index
    %c0_31 = arith.constant 0 : index
    %44 = vector.load %arg1[%c15, %c0_30, %c0_31] : memref<17x1x128xf32, #tpu.memory_space<vmem>>, vector<1x1x128xf32>
    %45 = vector.shape_cast %44 : vector<1x1x128xf32> to vector<1x128xf32>
    %46 = arith.maximumf %43, %45 : vector<1x128xf32>
    %c16 = arith.constant 16 : index
    %c0_32 = arith.constant 0 : index
    %c0_33 = arith.constant 0 : index
    %47 = vector.load %arg1[%c16, %c0_32, %c0_33] : memref<17x1x128xf32, #tpu.memory_space<vmem>>, vector<1x1x128xf32>
    %48 = vector.shape_cast %47 : vector<1x1x128xf32> to vector<1x128xf32>
    %49 = arith.maximumf %46, %48 : vector<1x128xf32>
    %c0_34 = arith.constant 0 : index
    %c0_35 = arith.constant 0 : index
    %c0_36 = arith.constant 0 : index
    %50 = vector.load %arg1[%c0_34, %c0_35, %c0_36] : memref<17x1x128xf32, #tpu.memory_space<vmem>>, vector<1x1x128xf32>
    %51 = vector.shape_cast %50 : vector<1x1x128xf32> to vector<1x128xf32>
    %52 = arith.subf %51, %49 : vector<1x128xf32>
    %53 = math.exp %52 : vector<1x128xf32>
    %cst = arith.constant 0.000000e+00 : f32
    %54 = vector.broadcast %cst : f32 to vector<1x128xf32>
    %c1_37 = arith.constant 1 : index
    %c0_38 = arith.constant 0 : index
    %c0_39 = arith.constant 0 : index
    %55 = vector.load %arg1[%c1_37, %c0_38, %c0_39] : memref<17x1x128xf32, #tpu.memory_space<vmem>>, vector<1x1x128xf32>
    %56 = vector.shape_cast %55 : vector<1x1x128xf32> to vector<1x128xf32>
    %57 = arith.subf %56, %49 : vector<1x128xf32>
    %58 = math.exp %57 : vector<1x128xf32>
    %59 = arith.addf %53, %58 : vector<1x128xf32>
    %cst_40 = arith.constant 1.000000e+00 : f32
    %60 = vector.broadcast %cst_40 : f32 to vector<1x128xf32>
    %61 = arith.mulf %58, %60 : vector<1x128xf32>
    %62 = arith.addf %54, %61 : vector<1x128xf32>
    %c2_41 = arith.constant 2 : index
    %c0_42 = arith.constant 0 : index
    %c0_43 = arith.constant 0 : index
    %63 = vector.load %arg1[%c2_41, %c0_42, %c0_43] : memref<17x1x128xf32, #tpu.memory_space<vmem>>, vector<1x1x128xf32>
    %64 = vector.shape_cast %63 : vector<1x1x128xf32> to vector<1x128xf32>
    %65 = arith.subf %64, %49 : vector<1x128xf32>
    %66 = math.exp %65 : vector<1x128xf32>
    %67 = arith.addf %59, %66 : vector<1x128xf32>
    %cst_44 = arith.constant 2.000000e+00 : f32
    %68 = vector.broadcast %cst_44 : f32 to vector<1x128xf32>
    %69 = arith.mulf %66, %68 : vector<1x128xf32>
    %70 = arith.addf %62, %69 : vector<1x128xf32>
    %c3_45 = arith.constant 3 : index
    %c0_46 = arith.constant 0 : index
    %c0_47 = arith.constant 0 : index
    %71 = vector.load %arg1[%c3_45, %c0_46, %c0_47] : memref<17x1x128xf32, #tpu.memory_space<vmem>>, vector<1x1x128xf32>
    %72 = vector.shape_cast %71 : vector<1x1x128xf32> to vector<1x128xf32>
    %73 = arith.subf %72, %49 : vector<1x128xf32>
    %74 = math.exp %73 : vector<1x128xf32>
    %75 = arith.addf %67, %74 : vector<1x128xf32>
    %cst_48 = arith.constant 3.000000e+00 : f32
    %76 = vector.broadcast %cst_48 : f32 to vector<1x128xf32>
    %77 = arith.mulf %74, %76 : vector<1x128xf32>
    %78 = arith.addf %70, %77 : vector<1x128xf32>
    %c4_49 = arith.constant 4 : index
    %c0_50 = arith.constant 0 : index
    %c0_51 = arith.constant 0 : index
    %79 = vector.load %arg1[%c4_49, %c0_50, %c0_51] : memref<17x1x128xf32, #tpu.memory_space<vmem>>, vector<1x1x128xf32>
    %80 = vector.shape_cast %79 : vector<1x1x128xf32> to vector<1x128xf32>
    %81 = arith.subf %80, %49 : vector<1x128xf32>
    %82 = math.exp %81 : vector<1x128xf32>
    %83 = arith.addf %75, %82 : vector<1x128xf32>
    %cst_52 = arith.constant 4.000000e+00 : f32
    %84 = vector.broadcast %cst_52 : f32 to vector<1x128xf32>
    %85 = arith.mulf %82, %84 : vector<1x128xf32>
    %86 = arith.addf %78, %85 : vector<1x128xf32>
    %c5_53 = arith.constant 5 : index
    %c0_54 = arith.constant 0 : index
    %c0_55 = arith.constant 0 : index
    %87 = vector.load %arg1[%c5_53, %c0_54, %c0_55] : memref<17x1x128xf32, #tpu.memory_space<vmem>>, vector<1x1x128xf32>
    %88 = vector.shape_cast %87 : vector<1x1x128xf32> to vector<1x128xf32>
    %89 = arith.subf %88, %49 : vector<1x128xf32>
    %90 = math.exp %89 : vector<1x128xf32>
    %91 = arith.addf %83, %90 : vector<1x128xf32>
    %cst_56 = arith.constant 5.000000e+00 : f32
    %92 = vector.broadcast %cst_56 : f32 to vector<1x128xf32>
    %93 = arith.mulf %90, %92 : vector<1x128xf32>
    %94 = arith.addf %86, %93 : vector<1x128xf32>
    %c6_57 = arith.constant 6 : index
    %c0_58 = arith.constant 0 : index
    %c0_59 = arith.constant 0 : index
    %95 = vector.load %arg1[%c6_57, %c0_58, %c0_59] : memref<17x1x128xf32, #tpu.memory_space<vmem>>, vector<1x1x128xf32>
    %96 = vector.shape_cast %95 : vector<1x1x128xf32> to vector<1x128xf32>
    %97 = arith.subf %96, %49 : vector<1x128xf32>
    %98 = math.exp %97 : vector<1x128xf32>
    %99 = arith.addf %91, %98 : vector<1x128xf32>
    %cst_60 = arith.constant 6.000000e+00 : f32
    %100 = vector.broadcast %cst_60 : f32 to vector<1x128xf32>
    %101 = arith.mulf %98, %100 : vector<1x128xf32>
    %102 = arith.addf %94, %101 : vector<1x128xf32>
    %c7_61 = arith.constant 7 : index
    %c0_62 = arith.constant 0 : index
    %c0_63 = arith.constant 0 : index
    %103 = vector.load %arg1[%c7_61, %c0_62, %c0_63] : memref<17x1x128xf32, #tpu.memory_space<vmem>>, vector<1x1x128xf32>
    %104 = vector.shape_cast %103 : vector<1x1x128xf32> to vector<1x128xf32>
    %105 = arith.subf %104, %49 : vector<1x128xf32>
    %106 = math.exp %105 : vector<1x128xf32>
    %107 = arith.addf %99, %106 : vector<1x128xf32>
    %cst_64 = arith.constant 7.000000e+00 : f32
    %108 = vector.broadcast %cst_64 : f32 to vector<1x128xf32>
    %109 = arith.mulf %106, %108 : vector<1x128xf32>
    %110 = arith.addf %102, %109 : vector<1x128xf32>
    %c8_65 = arith.constant 8 : index
    %c0_66 = arith.constant 0 : index
    %c0_67 = arith.constant 0 : index
    %111 = vector.load %arg1[%c8_65, %c0_66, %c0_67] : memref<17x1x128xf32, #tpu.memory_space<vmem>>, vector<1x1x128xf32>
    %112 = vector.shape_cast %111 : vector<1x1x128xf32> to vector<1x128xf32>
    %113 = arith.subf %112, %49 : vector<1x128xf32>
    %114 = math.exp %113 : vector<1x128xf32>
    %115 = arith.addf %107, %114 : vector<1x128xf32>
    %cst_68 = arith.constant 8.000000e+00 : f32
    %116 = vector.broadcast %cst_68 : f32 to vector<1x128xf32>
    %117 = arith.mulf %114, %116 : vector<1x128xf32>
    %118 = arith.addf %110, %117 : vector<1x128xf32>
    %c9_69 = arith.constant 9 : index
    %c0_70 = arith.constant 0 : index
    %c0_71 = arith.constant 0 : index
    %119 = vector.load %arg1[%c9_69, %c0_70, %c0_71] : memref<17x1x128xf32, #tpu.memory_space<vmem>>, vector<1x1x128xf32>
    %120 = vector.shape_cast %119 : vector<1x1x128xf32> to vector<1x128xf32>
    %121 = arith.subf %120, %49 : vector<1x128xf32>
    %122 = math.exp %121 : vector<1x128xf32>
    %123 = arith.addf %115, %122 : vector<1x128xf32>
    %cst_72 = arith.constant 9.000000e+00 : f32
    %124 = vector.broadcast %cst_72 : f32 to vector<1x128xf32>
    %125 = arith.mulf %122, %124 : vector<1x128xf32>
    %126 = arith.addf %118, %125 : vector<1x128xf32>
    %c10_73 = arith.constant 10 : index
    %c0_74 = arith.constant 0 : index
    %c0_75 = arith.constant 0 : index
    %127 = vector.load %arg1[%c10_73, %c0_74, %c0_75] : memref<17x1x128xf32, #tpu.memory_space<vmem>>, vector<1x1x128xf32>
    %128 = vector.shape_cast %127 : vector<1x1x128xf32> to vector<1x128xf32>
    %129 = arith.subf %128, %49 : vector<1x128xf32>
    %130 = math.exp %129 : vector<1x128xf32>
    %131 = arith.addf %123, %130 : vector<1x128xf32>
    %cst_76 = arith.constant 1.000000e+01 : f32
    %132 = vector.broadcast %cst_76 : f32 to vector<1x128xf32>
    %133 = arith.mulf %130, %132 : vector<1x128xf32>
    %134 = arith.addf %126, %133 : vector<1x128xf32>
    %c11_77 = arith.constant 11 : index
    %c0_78 = arith.constant 0 : index
    %c0_79 = arith.constant 0 : index
    %135 = vector.load %arg1[%c11_77, %c0_78, %c0_79] : memref<17x1x128xf32, #tpu.memory_space<vmem>>, vector<1x1x128xf32>
    %136 = vector.shape_cast %135 : vector<1x1x128xf32> to vector<1x128xf32>
    %137 = arith.subf %136, %49 : vector<1x128xf32>
    %138 = math.exp %137 : vector<1x128xf32>
    %139 = arith.addf %131, %138 : vector<1x128xf32>
    %cst_80 = arith.constant 1.100000e+01 : f32
    %140 = vector.broadcast %cst_80 : f32 to vector<1x128xf32>
    %141 = arith.mulf %138, %140 : vector<1x128xf32>
    %142 = arith.addf %134, %141 : vector<1x128xf32>
    %c12_81 = arith.constant 12 : index
    %c0_82 = arith.constant 0 : index
    %c0_83 = arith.constant 0 : index
    %143 = vector.load %arg1[%c12_81, %c0_82, %c0_83] : memref<17x1x128xf32, #tpu.memory_space<vmem>>, vector<1x1x128xf32>
    %144 = vector.shape_cast %143 : vector<1x1x128xf32> to vector<1x128xf32>
    %145 = arith.subf %144, %49 : vector<1x128xf32>
    %146 = math.exp %145 : vector<1x128xf32>
    %147 = arith.addf %139, %146 : vector<1x128xf32>
    %cst_84 = arith.constant 1.200000e+01 : f32
    %148 = vector.broadcast %cst_84 : f32 to vector<1x128xf32>
    %149 = arith.mulf %146, %148 : vector<1x128xf32>
    %150 = arith.addf %142, %149 : vector<1x128xf32>
    %c13_85 = arith.constant 13 : index
    %c0_86 = arith.constant 0 : index
    %c0_87 = arith.constant 0 : index
    %151 = vector.load %arg1[%c13_85, %c0_86, %c0_87] : memref<17x1x128xf32, #tpu.memory_space<vmem>>, vector<1x1x128xf32>
    %152 = vector.shape_cast %151 : vector<1x1x128xf32> to vector<1x128xf32>
    %153 = arith.subf %152, %49 : vector<1x128xf32>
    %154 = math.exp %153 : vector<1x128xf32>
    %155 = arith.addf %147, %154 : vector<1x128xf32>
    %cst_88 = arith.constant 1.300000e+01 : f32
    %156 = vector.broadcast %cst_88 : f32 to vector<1x128xf32>
    %157 = arith.mulf %154, %156 : vector<1x128xf32>
    %158 = arith.addf %150, %157 : vector<1x128xf32>
    %c14_89 = arith.constant 14 : index
    %c0_90 = arith.constant 0 : index
    %c0_91 = arith.constant 0 : index
    %159 = vector.load %arg1[%c14_89, %c0_90, %c0_91] : memref<17x1x128xf32, #tpu.memory_space<vmem>>, vector<1x1x128xf32>
    %160 = vector.shape_cast %159 : vector<1x1x128xf32> to vector<1x128xf32>
    %161 = arith.subf %160, %49 : vector<1x128xf32>
    %162 = math.exp %161 : vector<1x128xf32>
    %163 = arith.addf %155, %162 : vector<1x128xf32>
    %cst_92 = arith.constant 1.400000e+01 : f32
    %164 = vector.broadcast %cst_92 : f32 to vector<1x128xf32>
    %165 = arith.mulf %162, %164 : vector<1x128xf32>
    %166 = arith.addf %158, %165 : vector<1x128xf32>
    %c15_93 = arith.constant 15 : index
    %c0_94 = arith.constant 0 : index
    %c0_95 = arith.constant 0 : index
    %167 = vector.load %arg1[%c15_93, %c0_94, %c0_95] : memref<17x1x128xf32, #tpu.memory_space<vmem>>, vector<1x1x128xf32>
    %168 = vector.shape_cast %167 : vector<1x1x128xf32> to vector<1x128xf32>
    %169 = arith.subf %168, %49 : vector<1x128xf32>
    %170 = math.exp %169 : vector<1x128xf32>
    %171 = arith.addf %163, %170 : vector<1x128xf32>
    %cst_96 = arith.constant 1.500000e+01 : f32
    %172 = vector.broadcast %cst_96 : f32 to vector<1x128xf32>
    %173 = arith.mulf %170, %172 : vector<1x128xf32>
    %174 = arith.addf %166, %173 : vector<1x128xf32>
    %c16_97 = arith.constant 16 : index
    %c0_98 = arith.constant 0 : index
    %c0_99 = arith.constant 0 : index
    %175 = vector.load %arg1[%c16_97, %c0_98, %c0_99] : memref<17x1x128xf32, #tpu.memory_space<vmem>>, vector<1x1x128xf32>
    %176 = vector.shape_cast %175 : vector<1x1x128xf32> to vector<1x128xf32>
    %177 = arith.subf %176, %49 : vector<1x128xf32>
    %178 = math.exp %177 : vector<1x128xf32>
    %179 = arith.addf %171, %178 : vector<1x128xf32>
    %cst_100 = arith.constant 1.600000e+01 : f32
    %180 = vector.broadcast %cst_100 : f32 to vector<1x128xf32>
    %181 = arith.mulf %178, %180 : vector<1x128xf32>
    %182 = arith.addf %174, %181 : vector<1x128xf32>
    %183 = tpu.reciprocal %179 : vector<1x128xf32> -> vector<1x128xf32>
    %184 = arith.mulf %182, %183 : vector<1x128xf32>
    %c0_101 = arith.constant 0 : index
    %c0_102 = arith.constant 0 : index
    %185 = vector.load %arg2[%c0_101, %c0_102] : memref<1x128xf32, #tpu.memory_space<vmem>>, vector<1x128xf32>
    tpu.vector_store %arg2[%c0_101, %c0_102], %184 {strides = array<i32>} : memref<1x128xf32, #tpu.memory_space<vmem>>, vector<1x128xf32>,
    return
  }
  func.func @transform_0(%arg0: i32) -> (i32, i32, i32) {
    %c0_i32 = arith.constant 0 : i32
    %c0_i32_0 = arith.constant 0 : i32
    %c0_i32_1 = arith.constant 0 : i32
    return %c0_i32, %arg0, %c0_i32_0 : i32, i32, i32
  }
  func.func @transform_1(%arg0: i32) -> (i32, i32) {
    %c0_i32 = arith.constant 0 : i32
    %c0_i32_0 = arith.constant 0 : i32
    return %arg0, %c0_i32 : i32, i32
  }
}

</mosaic_0001>

<bundles_post_ra>
// kernel: tpu_custom_call.1
= control target key start
LH: loop header
LB: loop body
LE: loop exit
PB: predicated region body
PF: predicated region fallthrough
CT: control target
= control target key end

     0   :  { %6 = vsyncpa [#allocation3], 0  ;;  %s349_s0 = inlined_call_operand.hbm [shape: f32[17,1,128], index: 0, kind: input, shape index: {}]   ;;  %s350_s1 = inlined_call_operand.hbm [shape: f32[1,128], index: 1, kind: output, shape index: {}]  }
   0x1   :  { %7 = vsyncpa [#allocation4], 0  ;;  %s276_s6 = smov [#allocation2]   ;;  %s228_s10 = scalar_lea.hbm %s349_s0, 272 }
   0x2   :  { %s13_s7 = sshll.u32 %s276_s6, 4  ;;  %p229_p0 = scmp.ne.s32.totalorder %s349_s0, %s228_s10  ;;  %s14_s7 = int_to_ptr.vmem [resolvable:$true] %s13_s7 }
   0x3   :  { %p232_p1 = scmp.lt.u32.totalorder %s228_s10, %s349_s0 }
   0x5   :  { %p234_p2 = pnand %p232_p1, %p229_p0 }
   0x7   :  { %237 = shalt.err (!%p234_p2)
}
   0x8   :  { %s238_s15 = scalar_lea.vmem %s14_s7, 272  ;;  %s242_s16 = scalar_lea.vmem %s14_s7, 288 }
   0x9   :  { %p239_p3 = scmp.ne.s32.totalorder %s14_s7, %s238_s15  ;;  %p243_p4 = scmp.lt.s32.totalorder %s14_s7, %s14_s7 }
   0xa   :  { %p244_p5 = scmp.lt.s32.totalorder %s242_s16, %s238_s15 }
   0xc   :  { %p245_p6 = por %p244_p5, %p243_p4 }
   0xe   :  { %p246_p7 = pnand %p245_p6, %p239_p3 }
  0x10   :  { %249 = shalt.err (!%p246_p7)
}
  0x11   :  { %s277_s17 = smov 16   ;;  %s278_s18 = smov 1  }
  0x12   :  { %19 = dma.hbm_to_vmem [thread:$0]  %s349_s0, 272, %s14_s7, [#allocation3], %s277_s17, %s277_s17, %s278_s18  }
  0x13   :  { %272 = dma.done.wait [#allocation3], 272  }
  0x14   :  { %273 = vsyncadd [#allocation3], 4294967024  ;;  %v23_v0 = vld [vmem:[#allocation2] sm:$0x1]  ;;  %v25_v1 = vld [vmem:[#allocation2 + $0x1] sm:$0x1] }
  0x15   :  { %v28_v2 = vld [vmem:[#allocation2 + $0x2] sm:$0x1]  ;;  %v26_v3 = vmax.f32 %v23_v0, %v25_v1  ;;  %v31_v4 = vld [vmem:[#allocation2 + $0x3] sm:$0x1]  ;;  %v34_v6 = vld [vmem:[#allocation2 + $0x4] sm:$0x1] }
  0x16   :  { %v37_v8 = vld [vmem:[#allocation2 + $0x5] sm:$0x1]  ;;  %v40_v10 = vld [vmem:[#allocation2 + $0x6] sm:$0x1]  ;;  %v43_v12 = vld [vmem:[#allocation2 + $0x7] sm:$0x1] }
  0x17   :  { %v29_v5 = vmax.f32 %v26_v3, %v28_v2  ;;  %v46_v14 = vld [vmem:[#allocation2 + $0x8] sm:$0x1]  ;;  %v49_v16 = vld [vmem:[#allocation2 + $0x9] sm:$0x1]  ;;  %v52_v18 = vld [vmem:[#allocation2 + $0xa] sm:$0x1] }
  0x18   :  { %v55_v20 = vld [vmem:[#allocation2 + $0xb] sm:$0x1]  ;;  %v58_v22 = vld [vmem:[#allocation2 + $0xc] sm:$0x1]  ;;  %v302_v24 = vld [vmem:[#allocation2 + $0xd] sm:$0x1] }
  0x19   :  { %v32_v7 = vmax.f32 %v29_v5, %v31_v4  ;;  %v304_v26 = vld [vmem:[#allocation2 + $0xe] sm:$0x1]  ;;  %v307_v28 = vld [vmem:[#allocation2 + $0xf] sm:$0x1]  ;;  %v310_v30 = vld [vmem:[#allocation2 + $0x10] sm:$0x1] }
  0x1a   :  { %s279_s0 = smov [#allocation5]  }
  0x1b   :  { %v35_v9 = vmax.f32 %v32_v7, %v34_v6  ;;  %s179_s21 = sshll.u32 %s279_s0, 4  ;;  %s180_s21 = int_to_ptr.vmem [resolvable:$true] %s179_s21 }
  0x1c   :  { %s250_s22 = scalar_lea.vmem %s180_s21, 16  ;;  %s254_s23 = scalar_lea.vmem %s180_s21, 32 }
  0x1d   :  { %v38_v11 = vmax.f32 %v35_v9, %v37_v8  ;;  %p251_p8 = scmp.ne.s32.totalorder %s180_s21, %s250_s22  ;;  %p255_p9 = scmp.lt.s32.totalorder %s180_s21, %s180_s21 }
  0x1e   :  { %p256_p10 = scmp.lt.s32.totalorder %s254_s23, %s250_s22 }
  0x1f   :  { %v41_v13 = vmax.f32 %v38_v11, %v40_v10 }
  0x20   :  { %p257_p11 = por %p256_p10, %p255_p9 }
  0x21   :  { %v44_v15 = vmax.f32 %v41_v13, %v43_v12 }
  0x22   :  { %p258_p12 = pnand %p257_p11, %p251_p8 }
  0x23   :  { %v47_v17 = vmax.f32 %v44_v15, %v46_v14 }
  0x25   :  { %v50_v19 = vmax.f32 %v47_v17, %v49_v16 }
  0x27   :  { %v53_v21 = vmax.f32 %v50_v19, %v52_v18 }
  0x29   :  { %v56_v23 = vmax.f32 %v53_v21, %v55_v20 }
  0x2b   :  { %v59_v25 = vmax.f32 %v56_v23, %v58_v22 }
  0x2d   :  { %v62_v27 = vmax.f32 %v59_v25, %v302_v24 }
  0x2f   :  { %v65_v29 = vmax.f32 %v62_v27, %v304_v26 }
  0x31   :  { %v68_v31 = vmax.f32 %v65_v29, %v307_v28 }
  0x33   :  { %v314_v32 = vmax.f32 %v68_v31, %v310_v30 }
  0x35   :  { %v72_v33 = vsub.f32 %v23_v0, %v314_v32  ;;  %v75_v34 = vsub.f32 %v25_v1, %v314_v32  ;;  %v80_v35 = vsub.f32 %v28_v2, %v314_v32  ;;  %v86_v36 = vsub.f32 %v31_v4, %v314_v32 }
  0x36   :  { %v92_v37 = vsub.f32 %v34_v6, %v314_v32  ;;  %v98_v41 = vsub.f32 %v37_v8, %v314_v32  ;;  %v104_v44 = vsub.f32 %v40_v10, %v314_v32  ;;  %v110_v46 = vsub.f32 %v43_v12, %v314_v32 }
  0x37   :  { %v73_v38 = vmul.f32 1.442695, %v72_v33  ;;  %v76_v39 = vmul.f32 1.442695, %v75_v34  ;;  %v81_v40 = vmul.f32 1.442695, %v80_v35  ;;  %v116_v48 = vsub.f32 %v46_v14, %v314_v32 }
  0x38   :  { %v87_v42 = vmul.f32 1.442695, %v86_v36  ;;  %v93_v43 = vmul.f32 1.442695, %v92_v37  ;;  %v99_v45 = vmul.f32 1.442695, %v98_v41  ;;  %v122_v50 = vsub.f32 %v49_v16, %v314_v32 }
  0x39   :  { %192 = vpow2.f32 %v73_v38  ;;  %v105_v47 = vmul.f32 1.442695, %v104_v44  ;;  %v111_v49 = vmul.f32 1.442695, %v110_v46  ;;  %v117_v51 = vmul.f32 1.442695, %v116_v48 }
  0x3a   :  { %194 = vpow2.f32 %v76_v39  ;;  %v128_v52 = vsub.f32 %v52_v18, %v314_v32  ;;  %v123_v54 = vmul.f32 1.442695, %v122_v50  ;;  %v134_v55 = vsub.f32 %v55_v20, %v314_v32 }
  0x3b   :  { %196 = vpow2.f32 %v81_v40  ;;  %v140_v60 = vsub.f32 %v58_v22, %v314_v32  ;;  %v146_v5 = vsub.f32 %v302_v24, %v314_v32  ;;  %v152_v11 = vsub.f32 %v304_v26, %v314_v32 }
  0x3c   :  { %198 = vpow2.f32 %v87_v42  ;;  %v129_v59 = vmul.f32 1.442695, %v128_v52  ;;  %v135_v2 = vmul.f32 1.442695, %v134_v55  ;;  %v158_v17 = vsub.f32 %v307_v28, %v314_v32 }
  0x3d   :  { %200 = vpow2.f32 %v93_v43  ;;  %v141_v8 = vmul.f32 1.442695, %v140_v60  ;;  %v147_v16 = vmul.f32 1.442695, %v146_v5  ;;  %v153_v22 = vmul.f32 1.442695, %v152_v11 }
  0x3e   :  { %202 = vpow2.f32 %v99_v45  ;;  %v164_v23 = vsub.f32 %v310_v30, %v314_v32  ;;  %v159_v29 = vmul.f32 1.442695, %v158_v17 }
  0x3f   :  { %204 = vpow2.f32 %v105_v47 }
  0x40   :  { %206 = vpow2.f32 %v111_v49  ;;  %v165_v28 = vmul.f32 1.442695, %v164_v23 }
  0x41   :  { %208 = vpow2.f32 %v117_v51 }
  0x42   :  { %210 = vpow2.f32 %v123_v54 }
  0x43   :  { %v193_v53 = vpop.eup %192  ;;  %212 = vpow2.f32 %v129_v59 }
  0x44   :  { %v195_v56 = vpop.eup %194  ;;  %214 = vpow2.f32 %v135_v2 }
  0x45   :  { %v197_v57 = vpop.eup %196  ;;  %v78_v58 = vadd.f32 %v195_v56, %v193_v53  ;;  %216 = vpow2.f32 %v141_v8 }
  0x46   :  { %v199_v61 = vpop.eup %198  ;;  %v84_v62 = vmul.f32 2.0, %v197_v57  ;;  %218 = vpow2.f32 %v147_v16 }
  0x47   :  { %v201_v63 = vpop.eup %200  ;;  %v83_v0 = vadd.f32 %v197_v57, %v78_v58  ;;  %v90_v1 = vmul.f32 3.0, %v199_v61  ;;  %220 = vpow2.f32 %v153_v22 }
  0x48   :  { %v85_v3 = vadd.f32 %v195_v56, %v84_v62  ;;  %v96_v4 = vmul.f32 4.0, %v201_v63  ;;  %v203_v6 = vpop.eup %202  ;;  %222 = vpow2.f32 %v159_v29 }
  0x49   :  { %v89_v7 = vadd.f32 %v199_v61, %v83_v0  ;;  %v102_v10 = vmul.f32 5.0, %v203_v6  ;;  %v205_v12 = vpop.eup %204  ;;  %224 = vpow2.f32 %v165_v28 }
  0x4a   :  { %v91_v9 = vadd.f32 %v90_v1, %v85_v3  ;;  %v108_v15 = vmul.f32 6.0, %v205_v12  ;;  %v207_v18 = vpop.eup %206 }
  0x4b   :  { %v95_v13 = vadd.f32 %v201_v63, %v89_v7  ;;  %v114_v21 = vmul.f32 7.0, %v207_v18  ;;  %v209_v24 = vpop.eup %208 }
  0x4c   :  { %v97_v14 = vadd.f32 %v96_v4, %v91_v9  ;;  %v120_v27 = vmul.f32 8.0, %v209_v24  ;;  %v211_v31 = vpop.eup %210 }
  0x4d   :  { %v101_v19 = vadd.f32 %v203_v6, %v95_v13  ;;  %v126_v35 = vmul.f32 9.0, %v211_v31  ;;  %v213_v36 = vpop.eup %212 }
  0x4e   :  { %v103_v20 = vadd.f32 %v102_v10, %v97_v14  ;;  %v132_v39 = vmul.f32 10.0, %v213_v36  ;;  %v215_v40 = vpop.eup %214 }
  0x4f   :  { %v107_v25 = vadd.f32 %v205_v12, %v101_v19  ;;  %v138_v32 = vmul.f32 11.0, %v215_v40  ;;  %v217_v42 = vpop.eup %216 }
  0x50   :  { %v109_v26 = vadd.f32 %v108_v15, %v103_v20  ;;  %v144_v45 = vmul.f32 12.0, %v217_v42  ;;  %v219_v47 = vpop.eup %218 }
  0x51   :  { %v113_v33 = vadd.f32 %v207_v18, %v107_v25  ;;  %v221_v50 = vpop.eup %220  ;;  %v150_v52 = vmul.f32 13.0, %v219_v47 }
  0x52   :  { %v115_v34 = vadd.f32 %v114_v21, %v109_v26  ;;  %v223_v54 = vpop.eup %222  ;;  %v156_v58 = vmul.f32 14.0, %v221_v50 }
  0x53   :  { %v119_v37 = vadd.f32 %v209_v24, %v113_v33  ;;  %v225_v56 = vpop.eup %224  ;;  %v162_v62 = vmul.f32 15.0, %v223_v54 }
  0x54   :  { %v121_v38 = vadd.f32 %v120_v27, %v115_v34  ;;  %v168_v0 = vmul.f32 16.0, %v225_v56 }
  0x55   :  { %v125_v41 = vadd.f32 %v211_v31, %v119_v37 }
  0x56   :  { %v127_v30 = vadd.f32 %v126_v35, %v121_v38 }
  0x57   :  { %v131_v43 = vadd.f32 %v213_v36, %v125_v41 }
  0x58   :  { %v133_v44 = vadd.f32 %v132_v39, %v127_v30 }
  0x59   :  { %v137_v46 = vadd.f32 %v215_v40, %v131_v43 }
  0x5a   :  { %v139_v48 = vadd.f32 %v138_v32, %v133_v44 }
  0x5b   :  { %v143_v49 = vadd.f32 %v217_v42, %v137_v46 }
  0x5c   :  { %v145_v51 = vadd.f32 %v144_v45, %v139_v48 }
  0x5d   :  { %v149_v53 = vadd.f32 %v219_v47, %v143_v49 }
  0x5e   :  { %v151_v57 = vadd.f32 %v150_v52, %v145_v51 }
  0x5f   :  { %v155_v55 = vadd.f32 %v221_v50, %v149_v53 }
  0x60   :  { %v157_v61 = vadd.f32 %v156_v58, %v151_v57 }
  0x61   :  { %v161_v59 = vadd.f32 %v223_v54, %v155_v55 }
  0x62   :  { %v163_v63 = vadd.f32 %v162_v62, %v157_v61 }
  0x63   :  { %v167_v60 = vadd.f32 %v225_v56, %v161_v59 }
  0x64   :  { %v169_v1 = vadd.f32 %v168_v0, %v163_v63 }
  0x65   :  { %226 = vrcp.f32 %v167_v60 }
  0x6f   :  { %v227_v2 = vpop.eup %226 }
  0x70   :  { %v171_v3 = vmul.f32 %v227_v2, %v169_v1 }
  0x72   :  { %172 = vst [vmem:[#allocation5] sm:$0x1] %v171_v3 }
  0x73   :  { %261 = shalt.err (!%p258_p12)
}
  0x74   :  { %s262_s26 = scalar_lea.hbm %s350_s1, 16 }
  0x75   :  { %p263_p13 = scmp.ne.s32.totalorder %s350_s1, %s262_s26  ;;  %p266_p0 = scmp.lt.u32.totalorder %s262_s26, %s350_s1 }
  0x77   :  { %p268_p1 = pnand %p266_p0, %p263_p13 }
  0x79   :  { %271 = shalt.err (!%p268_p1)
}
  0x7a   :  { %182 = dma.vmem_to_hbm [thread:$0]  %s180_s21, 16, %s350_s1, [#allocation4]  }
  0x7b   :  { %274 = dma.done.wait [#allocation4], 16  }
  0x7c   :  { %275 = vsyncadd [#allocation4], 4294967280 }
  0x7d   :  { %186 = vsyncpa [#allocation3], 1 }
  0x7e   :  { %187 = vsyncpa [#allocation4], 1 }

</bundles_post_ra>
